<compile_context>
chip_gen: v7x
topology: tpu7x:2x2x1
jax: 0.10.0
libtpu: 0.0.40
codegen_flags: <defaults>
</compile_context>

<pallas_src>
import jax
import jax.numpy as jnp
from jax.experimental import pallas as pl
from jax.experimental.pallas import tpu as pltpu

_ALPHA = 0.5    # Tversky FP weight
_BETA = 0.5     # Tversky FN weight
_SMOOTH = 1.0   # Tversky smoothing
_LANES = 128


def _cdiv(a, b):
    return (a + b - 1) // b


def _round_up(a, b):
    return _cdiv(a, b) * b


def _loss_kernel(p_ref, y_ref, acc_ref):
    # acc_ref: (4, 8, 128) f32 VMEM output block, resident across the inner axis.
    #   plane 0: sum of per-element BCE terms
    #   plane 1: sum(p)   plane 2: sum(y)   plane 3: sum(p*y)  (= TP)
    i = pl.program_id(1)

    @pl.when(i == 0)
    def _():
        acc_ref[...] = jnp.zeros_like(acc_ref)

    p = p_ref[...].astype(jnp.float32)
    y = y_ref[...].astype(jnp.float32)

    # BCE term, logs clamped at -100 (torch.nn.BCELoss), fused form:
    #   -(y*logp + (1-y)*log1mp) == -(log1mp + y*(logp - log1mp))
    logp = jnp.maximum(jnp.log(p), -100.0)
    log1mp = jnp.maximum(jnp.log(1.0 - p), -100.0)
    bce = -(log1mp + y * (logp - log1mp))

    t = p.shape[0] // 8
    lanes = p.shape[1]

    def fold(x):
        # (tile_rows, 128) -> (8, 128) via elementwise vreg adds (VPU only).
        return jnp.sum(x.reshape(t, 8, lanes), axis=0)

    acc_ref[0] += fold(bce)
    acc_ref[1] += fold(p)
    acc_ref[2] += fold(y)
    acc_ref[3] += fold(p * y)


def combined_loss(y_pred, y_true, *, tile_rows=1024, n_par=2):
    assert y_pred.shape == y_true.shape
    n_elems = y_pred.size

    rows = _cdiv(n_elems, _LANES)
    # Clamp the tile so small inputs still work; keep it a multiple of 8.
    tile_rows = max(8, min(tile_rows, _round_up(_cdiv(rows, n_par), 8)))
    rows_per_par = _round_up(_cdiv(rows, n_par), tile_rows)
    total_rows = rows_per_par * n_par
    grid_inner = rows_per_par // tile_rows
    padded = total_rows * _LANES

    p_flat = y_pred.reshape(-1)
    y_flat = y_true.reshape(-1)
    if padded != n_elems:
        # Zero padding (p=0, y=0) contributes exactly 0 to all partial sums.
        p_flat = jnp.pad(p_flat, (0, padded - n_elems))
        y_flat = jnp.pad(y_flat, (0, padded - n_elems))
    p2d = p_flat.reshape(total_rows, _LANES)
    y2d = y_flat.reshape(total_rows, _LANES)

    in_map = lambda c, i: (c * grid_inner + i, 0)

    partials = pl.pallas_call(
        _loss_kernel,
        out_shape=jax.ShapeDtypeStruct((n_par, 4, 8, _LANES), jnp.float32),
        grid_spec=pltpu.PrefetchScalarGridSpec(
            num_scalar_prefetch=0,
            grid=(n_par, grid_inner),
            in_specs=[
                pl.BlockSpec((tile_rows, _LANES), in_map),
                pl.BlockSpec((tile_rows, _LANES), in_map),
            ],
            out_specs=pl.BlockSpec((None, 4, 8, _LANES),
                                   lambda c, i: (c, 0, 0, 0)),
        ),
        compiler_params=pltpu.CompilerParams(
            dimension_semantics=("parallel", "arbitrary")),
    )(p2d, y2d)

    # Tiny epilogue: reduce (n_par, 4, 8, 128) partials to the scalar loss.
    sums = jnp.sum(partials, axis=(0, 2, 3))
    bce = sums[0] / jnp.float32(n_elems)
    tp = sums[3]
    fp = sums[1] - tp
    fn = sums[2] - tp
    tversky = (tp + _SMOOTH) / (tp + _ALPHA * fp + _BETA * fn + _SMOOTH)
    return 0.5 * bce + 0.5 * (1.0 - tversky)


def _reference_loss(y_pred, y_true):
    p = y_pred.astype(jnp.float32)
    y = y_true.astype(jnp.float32)
    logp = jnp.maximum(jnp.log(p), -100.0)
    log1mp = jnp.maximum(jnp.log(1.0 - p), -100.0)
    bce = jnp.mean(-(y * logp + (1.0 - y) * log1mp))
    tp = jnp.sum(p * y)
    fp = jnp.sum(p * (1.0 - y))
    fn = jnp.sum((1.0 - p) * y)
    tversky = (tp + _SMOOTH) / (tp + _ALPHA * fp + _BETA * fn + _SMOOTH)
    return 0.5 * bce + 0.5 * (1.0 - tversky)


if __name__ == "__main__":
    key = jax.random.PRNGKey(0)
    k1, k2 = jax.random.split(key)
    # NCHW inputs: batch=2, channels=4, spatial=16x16
    shape = (2, 4, 16, 16)
    y_pred = jax.nn.sigmoid(jax.random.normal(k1, shape, dtype=jnp.float32))
    y_true = (jax.random.uniform(k2, shape) > 0.5).astype(jnp.float32)

    loss = combined_loss(y_pred, y_true)
    loss = jax.block_until_ready(loss)

    ref = _reference_loss(y_pred, y_true)
    assert jnp.allclose(loss, ref, rtol=1e-5, atol=1e-5), (loss, ref)

    print("KERNEL_OK")
</pallas_src>

<mosaic_0001>
module attributes {stable_mosaic.version = 11 : i64} {
  func.func @_loss_kernel(%arg0: i32, %arg1: i32, %arg2: memref<8x128xf32, #tpu.memory_space<vmem>>, %arg3: memref<8x128xf32, #tpu.memory_space<vmem>>, %arg4: memref<1x4x8x128xf32, #tpu.memory_space<vmem>>) attributes {dimension_semantics = [#tpu.dimension_semantics<parallel>, #tpu.dimension_semantics<arbitrary>], iteration_bounds = array<i64: 2, 1>, scalar_prefetch = 0 : i64, scratch_operands = 0 : i64, tpu.core_type = #tpu.core_type<tc>, window_params = [{transform_indices = @transform_0, window_bounds = array<i64: 8, 128>}, {transform_indices = @transform_1, window_bounds = array<i64: 8, 128>}, {transform_indices = @transform_2, window_bounds = array<i64: 1, 4, 8, 128>}]} {
    %c0_i32 = arith.constant 0 : i32
    %0 = arith.cmpi eq, %arg1, %c0_i32 : i32
    %1 = arith.extui %0 : i1 to i32
    %c0_i32_0 = arith.constant 0 : i32
    %2 = arith.cmpi ne, %1, %c0_i32_0 : i32
    scf.if %2 {
      %cst_40 = arith.constant 0.000000e+00 : f32
      %51 = vector.broadcast %cst_40 : f32 to vector<4x8x128xf32>
      %c0_41 = arith.constant 0 : index
      %c0_42 = arith.constant 0 : index
      %c0_43 = arith.constant 0 : index
      %c0_44 = arith.constant 0 : index
      %52 = vector.load %arg4[%c0_41, %c0_42, %c0_43, %c0_44] : memref<1x4x8x128xf32, #tpu.memory_space<vmem>>, vector<1x4x8x128xf32>
      %53 = vector.shape_cast %52 : vector<1x4x8x128xf32> to vector<4x8x128xf32>
      %54 = vector.shape_cast %51 : vector<4x8x128xf32> to vector<1x4x8x128xf32>
      tpu.vector_store %arg4[%c0_41, %c0_42, %c0_43, %c0_44], %54 {strides = array<i32>} : memref<1x4x8x128xf32, #tpu.memory_space<vmem>>, vector<1x4x8x128xf32>,
    } else {
    }
    %c0 = arith.constant 0 : index
    %c0_1 = arith.constant 0 : index
    %3 = vector.load %arg2[%c0, %c0_1] : memref<8x128xf32, #tpu.memory_space<vmem>>, vector<8x128xf32>
    %c0_2 = arith.constant 0 : index
    %c0_3 = arith.constant 0 : index
    %4 = vector.load %arg3[%c0_2, %c0_3] : memref<8x128xf32, #tpu.memory_space<vmem>>, vector<8x128xf32>
    %5 = math.log %3 : vector<8x128xf32>
    %cst = arith.constant -1.000000e+02 : f32
    %6 = vector.broadcast %cst : f32 to vector<8x128xf32>
    %7 = arith.maximumf %5, %6 : vector<8x128xf32>
    %cst_4 = arith.constant 1.000000e+00 : f32
    %8 = vector.broadcast %cst_4 : f32 to vector<8x128xf32>
    %9 = arith.subf %8, %3 : vector<8x128xf32>
    %10 = math.log %9 : vector<8x128xf32>
    %cst_5 = arith.constant -1.000000e+02 : f32
    %11 = vector.broadcast %cst_5 : f32 to vector<8x128xf32>
    %12 = arith.maximumf %10, %11 : vector<8x128xf32>
    %13 = arith.subf %7, %12 : vector<8x128xf32>
    %14 = arith.mulf %4, %13 : vector<8x128xf32>
    %15 = arith.addf %12, %14 : vector<8x128xf32>
    %cst_6 = arith.constant 0.000000e+00 : f32
    %16 = vector.broadcast %cst_6 : f32 to vector<8x128xf32>
    %17 = arith.subf %16, %15 : vector<8x128xf32>
    %c0_7 = arith.constant 0 : index
    %c0_8 = arith.constant 0 : index
    %c0_9 = arith.constant 0 : index
    %c0_10 = arith.constant 0 : index
    %18 = vector.load %arg4[%c0_7, %c0_8, %c0_9, %c0_10] : memref<1x4x8x128xf32, #tpu.memory_space<vmem>>, vector<1x1x8x128xf32>
    %19 = vector.shape_cast %18 : vector<1x1x8x128xf32> to vector<8x128xf32>
    %20 = vector.shape_cast %17 : vector<8x128xf32> to vector<1x8x128xf32>
    %cst_11 = arith.constant dense<0.000000e+00> : vector<8x128xf32>
    %21 = vector.multi_reduction <add>, %20, %cst_11 [0] : vector<1x8x128xf32> to vector<8x128xf32>
    %22 = arith.addf %19, %21 : vector<8x128xf32>
    %c0_12 = arith.constant 0 : index
    %c0_13 = arith.constant 0 : index
    %c0_14 = arith.constant 0 : index
    %c0_15 = arith.constant 0 : index
    %23 = vector.load %arg4[%c0_12, %c0_13, %c0_14, %c0_15] : memref<1x4x8x128xf32, #tpu.memory_space<vmem>>, vector<1x1x8x128xf32>
    %24 = vector.shape_cast %23 : vector<1x1x8x128xf32> to vector<8x128xf32>
    %25 = vector.shape_cast %22 : vector<8x128xf32> to vector<1x1x8x128xf32>
    tpu.vector_store %arg4[%c0_12, %c0_13, %c0_14, %c0_15], %25 {strides = array<i32>} : memref<1x4x8x128xf32, #tpu.memory_space<vmem>>, vector<1x1x8x128xf32>,
    %c0_16 = arith.constant 0 : index
    %c1 = arith.constant 1 : index
    %c0_17 = arith.constant 0 : index
    %c0_18 = arith.constant 0 : index
    %26 = vector.load %arg4[%c0_16, %c1, %c0_17, %c0_18] : memref<1x4x8x128xf32, #tpu.memory_space<vmem>>, vector<1x1x8x128xf32>
    %27 = vector.shape_cast %26 : vector<1x1x8x128xf32> to vector<8x128xf32>
    %28 = vector.shape_cast %3 : vector<8x128xf32> to vector<1x8x128xf32>
    %cst_19 = arith.constant dense<0.000000e+00> : vector<8x128xf32>
    %29 = vector.multi_reduction <add>, %28, %cst_19 [0] : vector<1x8x128xf32> to vector<8x128xf32>
    %30 = arith.addf %27, %29 : vector<8x128xf32>
    %c0_20 = arith.constant 0 : index
    %c1_21 = arith.constant 1 : index
    %c0_22 = arith.constant 0 : index
    %c0_23 = arith.constant 0 : index
    %31 = vector.load %arg4[%c0_20, %c1_21, %c0_22, %c0_23] : memref<1x4x8x128xf32, #tpu.memory_space<vmem>>, vector<1x1x8x128xf32>
    %32 = vector.shape_cast %31 : vector<1x1x8x128xf32> to vector<8x128xf32>
    %33 = vector.shape_cast %30 : vector<8x128xf32> to vector<1x1x8x128xf32>
    tpu.vector_store %arg4[%c0_20, %c1_21, %c0_22, %c0_23], %33 {strides = array<i32>} : memref<1x4x8x128xf32, #tpu.memory_space<vmem>>, vector<1x1x8x128xf32>,
    %c0_24 = arith.constant 0 : index
    %c2 = arith.constant 2 : index
    %c0_25 = arith.constant 0 : index
    %c0_26 = arith.constant 0 : index
    %34 = vector.load %arg4[%c0_24, %c2, %c0_25, %c0_26] : memref<1x4x8x128xf32, #tpu.memory_space<vmem>>, vector<1x1x8x128xf32>
    %35 = vector.shape_cast %34 : vector<1x1x8x128xf32> to vector<8x128xf32>
    %36 = vector.shape_cast %4 : vector<8x128xf32> to vector<1x8x128xf32>
    %cst_27 = arith.constant dense<0.000000e+00> : vector<8x128xf32>
    %37 = vector.multi_reduction <add>, %36, %cst_27 [0] : vector<1x8x128xf32> to vector<8x128xf32>
    %38 = arith.addf %35, %37 : vector<8x128xf32>
    %c0_28 = arith.constant 0 : index
    %c2_29 = arith.constant 2 : index
    %c0_30 = arith.constant 0 : index
    %c0_31 = arith.constant 0 : index
    %39 = vector.load %arg4[%c0_28, %c2_29, %c0_30, %c0_31] : memref<1x4x8x128xf32, #tpu.memory_space<vmem>>, vector<1x1x8x128xf32>
    %40 = vector.shape_cast %39 : vector<1x1x8x128xf32> to vector<8x128xf32>
    %41 = vector.shape_cast %38 : vector<8x128xf32> to vector<1x1x8x128xf32>
    tpu.vector_store %arg4[%c0_28, %c2_29, %c0_30, %c0_31], %41 {strides = array<i32>} : memref<1x4x8x128xf32, #tpu.memory_space<vmem>>, vector<1x1x8x128xf32>,
    %c0_32 = arith.constant 0 : index
    %c3 = arith.constant 3 : index
    %c0_33 = arith.constant 0 : index
    %c0_34 = arith.constant 0 : index
    %42 = vector.load %arg4[%c0_32, %c3, %c0_33, %c0_34] : memref<1x4x8x128xf32, #tpu.memory_space<vmem>>, vector<1x1x8x128xf32>
    %43 = vector.shape_cast %42 : vector<1x1x8x128xf32> to vector<8x128xf32>
    %44 = arith.mulf %3, %4 : vector<8x128xf32>
    %45 = vector.shape_cast %44 : vector<8x128xf32> to vector<1x8x128xf32>
    %cst_35 = arith.constant dense<0.000000e+00> : vector<8x128xf32>
    %46 = vector.multi_reduction <add>, %45, %cst_35 [0] : vector<1x8x128xf32> to vector<8x128xf32>
    %47 = arith.addf %43, %46 : vector<8x128xf32>
    %c0_36 = arith.constant 0 : index
    %c3_37 = arith.constant 3 : index
    %c0_38 = arith.constant 0 : index
    %c0_39 = arith.constant 0 : index
    %48 = vector.load %arg4[%c0_36, %c3_37, %c0_38, %c0_39] : memref<1x4x8x128xf32, #tpu.memory_space<vmem>>, vector<1x1x8x128xf32>
    %49 = vector.shape_cast %48 : vector<1x1x8x128xf32> to vector<8x128xf32>
    %50 = vector.shape_cast %47 : vector<8x128xf32> to vector<1x1x8x128xf32>
    tpu.vector_store %arg4[%c0_36, %c3_37, %c0_38, %c0_39], %50 {strides = array<i32>} : memref<1x4x8x128xf32, #tpu.memory_space<vmem>>, vector<1x1x8x128xf32>,
    return
  }
  func.func @transform_0(%arg0: i32, %arg1: i32) -> (i32, i32) {
    %c1_i32 = arith.constant 1 : i32
    %0 = arith.muli %arg0, %c1_i32 : i32
    %1 = arith.addi %0, %arg1 : i32
    %c0_i32 = arith.constant 0 : i32
    %c0_i32_0 = arith.constant 0 : i32
    return %1, %c0_i32 : i32, i32
  }
  func.func @transform_1(%arg0: i32, %arg1: i32) -> (i32, i32) {
    %c1_i32 = arith.constant 1 : i32
    %0 = arith.muli %arg0, %c1_i32 : i32
    %1 = arith.addi %0, %arg1 : i32
    %c0_i32 = arith.constant 0 : i32
    %c0_i32_0 = arith.constant 0 : i32
    return %1, %c0_i32 : i32, i32
  }
  func.func @transform_2(%arg0: i32, %arg1: i32) -> (i32, i32, i32, i32) {
    %c0_i32 = arith.constant 0 : i32
    %c0_i32_0 = arith.constant 0 : i32
    %c0_i32_1 = arith.constant 0 : i32
    %c0_i32_2 = arith.constant 0 : i32
    return %arg0, %c0_i32, %c0_i32_0, %c0_i32_1 : i32, i32, i32, i32
  }
}

</mosaic_0001>

<bundles_post_ra>
// kernel: tpu_custom_call.1
= control target key start
LH: loop header
LB: loop body
LE: loop exit
PB: predicated region body
PF: predicated region fallthrough
CT: control target
= control target key end

     0   :  { %7 = vsyncpa [#allocation3], 0  ;;  %s866_s0 = inlined_call_operand.hbm [shape: f32[16,128], index: 0, kind: input, shape index: {}]   ;;  %s867_s1 = inlined_call_operand.hbm [shape: f32[16,128], index: 1, kind: input, shape index: {}]   ;;  %s868_s2 = inlined_call_operand.hbm [shape: f32[2,4,8,128], index: 2, kind: output, shape index: {}]  }
   0x1   :  { %9 = vsyncpa [#allocation3 + $0x1], 0 }
   0x2   :  { %10 = vsyncpa [#allocation6], 0 }
   0x3   :  { %12 = vsyncpa [#allocation6 + $0x1], 0 }
   0x4   :  { %13 = vsyncpa [#allocation4], 0 }
   0x5   :  { %15 = vsyncpa [#allocation4 + $0x1], 0  ;;  %s643_s9 = smov 0   ;;  %s645_s10 = smov 0  }
   0x6   :  { %s647_s11 = smov 0   ;;  %s649_s12 = smov 0  }
   0x7   :  { %s651_s13 = smov 0   ;;  %s653_s14 = smov 0  }
   0x8 LB: > { %s377_s15 = sadd.s32 4294967295, %s621_s14   ;;  %s378_s16 = sadd.s32 4294967294, %s621_s14   ;;  %s621_s14 = sphi %s653_s14, %s21_s14   ;;  %s617_s13 = sphi %s651_s13, %s888_s13   ;;  %s613_s12 = sphi %s649_s12, %s887_s12   ;;  %s609_s11 = sphi %s647_s11, %s886_s11   ;;  %s605_s10 = sphi %s645_s10, %s885_s10   ;;  %s601_s9 = sphi %s643_s9, %s884_s9  }
   0x9   : > { %s33_s17 = sadd.s32 1, %s617_s13  ;;  %s42_s18 = sadd.s32 1, %s609_s11 }
   0xa   : > { %p35_p0 = scmp.ge.s32.totalorder %s33_s17, 2  ;;  %p49_p1 = scmp.ne.s32.totalorder %s609_s11, %s605_s10 }
   0xb   : > { %p50_p2 = scmp.eq.s32.totalorder %s621_s14, 0  ;;  %p55_p3 = scmp.ne.s32.totalorder %s605_s10, %s601_s9 }
   0xc   : > { %s890_s17 = smov (%p35_p0, %s33_s17), 0  ;;  %p56_p5 = scmp.eq.s32.totalorder %s377_s15, 0 }
   0xd   : > { %p684_p4 = por %p50_p2, %p49_p1  ;;  %s39_s20 = ssub.s32 %s617_s13, %s890_s17 }
   0xe   : > { %p107_p6 = scmp.eq.s32.totalorder %s377_s15, 1  ;;  %p40_p7 = scmp.eq.s32.totalorder %s39_s20, 0 }
   0xf   : > { %p690_p8 = por %p56_p5, %p55_p3  ;;  %p113_p10 = scmp.eq.s32.totalorder %s378_s16, 1 }
  0x10   : > { %p694_p9 = por %p107_p6, %p49_p1  ;;  %p418_p13 = scmp.lt.s32.totalorder %s621_s14, 2 }
  0x11   : > { %s872_s21 = scalar_select %p690_p8, 1, 0 }
  0x12   : > { %s873_s22 = scalar_select %p694_p9, 1, 0 }
  0x13   : > { %s699_s23 = scalar_select %p40_p7, %s609_s11, %s42_s18  }
  0x14   : > { %p701_p11 = por %p113_p10, %p55_p3  ;;  %s708_s25 = sand.u32 1, %s609_s11  }
  0x15   : > { %s381_s26 = sshll.u32 %s708_s25, 3  ;;  %s382_s27 = sshll.u32 %s617_s13, 7 }
  0x16   : > { %s874_s24 = scalar_select %p701_p11, 1, 0 }
  0x17   : > { %s717_s30 = scalar_lea.hbm %s866_s0, %s382_s27  ;;  %s137_s3 = scalar_lea.vmem [#allocation2], %s381_s26 }
  0x18   : > { %s145_s4 = sshll.u32 %s137_s3, 4  ;;  %p725_p0 = pnand %p418_p13, %p684_p4  ;;  %s721_s4 = int_to_ptr.vmem [resolvable:$true] %s145_s4 }
  0x19   : > { %s134_s6 = scalar_lea.sflag [#allocation3], %s708_s25  ;;  %s475_s7 = scalar_lea.hbm %s717_s30, 128 }
  0x1a   : > { %p476_p3 = scmp.ne.s32.totalorder %s717_s30, %s475_s7  ;;  %p477_p5 = pneg %p725_p0 }
  0x1b   : > { %s480_s16 = scalar_lea.hbm %s866_s0, 256  ;;  %p481_p4 = scmp.lt.u32.totalorder %s717_s30, %s866_s0 }
  0x1c   : > { %p478_p6 = pnand %p477_p5, %p476_p3  ;;  %p482_p10 = scmp.lt.u32.totalorder %s480_s16, %s475_s7 }
  0x1d   : > { %p484_p12 = scmp.lt.u32.totalorder %s475_s7, %s717_s30 }
  0x1e   : > { %p479_p7 = pneg %p478_p6  ;;  %p483_p13 = por %p482_p10, %p481_p4 }
  0x20   : > { %p485_p1 = por %p484_p12, %p483_p13 }
  0x22   : > { %p486_p2 = pnand %p485_p1, %p479_p7 }
  0x24   : > { %489 = shalt.err (!%p486_p2)
}
  0x25   : > { %s490_s20 = scalar_lea.vmem %s721_s4, 128  ;;  %s623_s28 = smov [#allocation2]  }
  0x26   : > { %p491_p3 = scmp.ne.s32.totalorder %s721_s4, %s490_s20  ;;  %s495_s29 = sshll.u32 %s623_s28, 4  ;;  %s496_s29 = int_to_ptr.vmem [resolvable:$false] %s495_s29 }
  0x27   : > { %s497_s3 = scalar_lea.vmem %s496_s29, 256  ;;  %p498_p9 = scmp.lt.s32.totalorder %s721_s4, %s496_s29 }
  0x28   : > { %p493_p6 = pnand %p491_p3, %p477_p5  ;;  %p499_p4 = scmp.lt.s32.totalorder %s497_s3, %s490_s20 }
  0x2a   : > { %p494_p11 = pneg %p493_p6  ;;  %p500_p10 = por %p499_p4, %p498_p9 }
  0x2c   : > { %p501_p12 = pnand %p500_p10, %p494_p11 }
  0x2e   : > { %504 = shalt.err (!%p501_p12)
}
  0x2f   : > { %410 = dma.hbm_to_vmem [thread:$0]  (!%p725_p0), %s717_s30, 128, %s721_s4, %s134_s6  }
  0x30   : > { %p876_p1 = scmp.lt.s32.totalorder %s621_s14, 3  ;;  %p877_p2 = scmp.ge.s32.totalorder %s621_s14, 1 }
  0x31   : > { %s770_s16 = scalar_lea.hbm %s867_s1, %s382_s27  ;;  %s156_s18 = scalar_lea.vmem [#allocation5], %s381_s26 }
  0x32   : > { %p761_p7 = pnand %p877_p2, %p876_p1  ;;  %s164_s19 = sshll.u32 %s156_s18, 4  ;;  %s165_s19 = int_to_ptr.vmem [resolvable:$true] %s164_s19 }
  0x33   : > { %s153_s30 = scalar_lea.sflag [#allocation6], %s708_s25  ;;  %s505_s4 = scalar_lea.hbm %s770_s16, 128 }
  0x34   : > { %s878_s7 = scalar_select %p761_p7, 1, 0 }
  0x35   : > { %p506_p9 = scmp.ne.s32.totalorder %s770_s16, %s505_s4  ;;  %s510_s27 = scalar_lea.hbm %s867_s1, 256 }
  0x36   : > { %p511_p3 = scmp.lt.u32.totalorder %s770_s16, %s867_s1  ;;  %p512_p6 = scmp.lt.u32.totalorder %s510_s27, %s505_s4 }
  0x37   : > { %p508_p11 = pnand %p506_p9, %p477_p5  ;;  %p514_p10 = scmp.lt.u32.totalorder %s505_s4, %s770_s16 }
  0x38   : > { %p513_p4 = por %p512_p6, %p511_p3 }
  0x39   : > { %p509_p13 = pneg %p508_p11 }
  0x3a   : > { %p515_p12 = por %p514_p10, %p513_p4 }
  0x3c   : > { %p516_p1 = pnand %p515_p12, %p509_p13 }
  0x3e   : > { %519 = shalt.err (!%p516_p1)
}
  0x3f   : > { %s520_s25 = scalar_lea.vmem %s165_s19, 128  ;;  %s624_s26 = smov [#allocation5]  }
  0x40   : > { %p521_p2 = scmp.ne.s32.totalorder %s165_s19, %s520_s25  ;;  %s525_s3 = sshll.u32 %s624_s26, 4  ;;  %s526_s3 = int_to_ptr.vmem [resolvable:$false] %s525_s3 }
  0x41   : > { %s527_s8 = scalar_lea.vmem %s526_s3, 256  ;;  %p528_p8 = scmp.lt.s32.totalorder %s165_s19, %s526_s3 }
  0x42   : > { %p523_p9 = pnand %p521_p2, %p477_p5  ;;  %p529_p7 = scmp.lt.s32.totalorder %s527_s8, %s520_s25 }
  0x44   : > { %p524_p11 = pneg %p523_p9  ;;  %p530_p3 = por %p529_p7, %p528_p8 }
  0x46   : > { %p531_p6 = pnand %p530_p3, %p524_p11 }
  0x48   : > { %534 = shalt.err (!%p531_p6)
}
  0x49   : > { %413 = dma.hbm_to_vmem [thread:$0]  (!%p725_p0), %s770_s16, 128, %s165_s19, %s153_s30  }
  0x4a   : > { %p879_p13 = scmp.ne.s32.totalorder %s878_s7, 0 }
  0x4b   : > { %s797_s15 = sand.u32 (!%p879_p13), 1, %s605_s10   ;;  %p880_p5 = scmp.ne.s32.totalorder (!%p879_p13), %s872_s21, 0 }
  0x4c   : > { %173 = sbr.rel (%p879_p13) target bundleno = 127 (0x7f), region = 28  ;;  %s386_s18 = sshll.u32 (!%p879_p13), %s797_s15, 3 }
  0x4d   : > { %s176_s4 = scalar_lea.sflag (!%p879_p13), [#allocation3], %s797_s15  ;;  %s179_s6 = scalar_lea.vmem (!%p879_p13), [#allocation2], %s386_s18 }
  0x53   : > { %588 = dma.done.wait (%p880_p5), %s176_s4, 128  }
  0x54   : > { %590 = vsyncadd (%p880_p5), %s176_s4, 4294967168  ;;  %s185_s5 = scalar_lea.sflag [#allocation6], %s797_s15  ;;  %s188_s16 = scalar_lea.vmem [#allocation5], %s386_s18 }
  0x55   : > { %592 = dma.done.wait (%p880_p5), %s185_s5, 128  }
  0x56   : > { %594 = vsyncadd (%p880_p5), %s185_s5, 4294967168  ;;  %s388_s7 = sshll.u32 %s797_s15, 5  ;;  %v224_v0 = vld [vmem:[%s179_s6] sm:$0xff]  ;;  %v225_v1 = vld [vmem:[%s188_s16] sm:$0xff]  ;;  %s400_s21 = sshll.u32 %s613_s12, 9 }
  0x57   : > { %471 = vlog2.f32 %v224_v0  ;;  %v229_v2 = vsub.f32 1.0, %v224_v0  ;;  %v253_v3 = vmul.f32 %v225_v1, %v224_v0  ;;  %s213_s19 = scalar_lea.vmem [#allocation7], %s388_s7  ;;  %s815_s28 = scalar_lea.hbm %s868_s2, %s400_s21 }
  0x58   : > { %390 = vst [vmem:[%s213_s19 + $0x8] sm:$0xff] %v224_v0  ;;  %392 = vst [vmem:[%s213_s19 + $0x10] sm:$0xff] %v225_v1  ;;  %s271_s30 = sshll.u32 %s213_s19, 4  ;;  %s258_s29 = scalar_lea.sflag [#allocation4], %s797_s15  ;;  %s817_s30 = int_to_ptr.vmem [resolvable:$true] %s271_s30 }
  0x59   : > { %473 = vlog2.f32 %v229_v2  ;;  %394 = vst [vmem:[%s213_s19 + $0x18] sm:$0xff] %v253_v3  ;;  %s535_s25 = scalar_lea.vmem %s817_s30, 512  ;;  %p881_p0 = scmp.ne.s32.totalorder %s873_s22, 0 }
  0x5a   : > { %p536_p8 = scmp.ne.s32.totalorder %s817_s30, %s535_s25  ;;  %s625_s12 = smov [#allocation7]  }
  0x5b   : > { %s539_s26 = sshll.u32 %s625_s12, 4  ;;  %s540_s26 = int_to_ptr.vmem [resolvable:$false] %s539_s26 }
  0x5c   : > { %p537_p7 = pnand %p536_p8, %p881_p0  ;;  %s541_s3 = scalar_lea.vmem %s540_s26, 1024 }
  0x5d   : > { %p542_p10 = scmp.lt.s32.totalorder %s817_s30, %s540_s26  ;;  %p543_p12 = scmp.lt.s32.totalorder %s541_s3, %s535_s25 }
  0x5e   : > { %p538_p4 = pneg %p537_p7 }
  0x5f   : > { %p544_p1 = por %p543_p12, %p542_p10 }
  0x61   : > { %v472_v4 = vpop.eup %471  ;;  %p545_p2 = pnand %p544_p1, %p538_p4 }
  0x62   : > { %v227_v5 = vmul.f32 0.6931472, %v472_v4 }
  0x63   : > { %v474_v6 = vpop.eup %473 }
  0x64   : > { %v228_v7 = vmax.f32 %v227_v5, -100.0  ;;  %v231_v8 = vmul.f32 0.6931472, %v474_v6 }
  0x66   : > { %v232_v9 = vmax.f32 %v231_v8, -100.0 }
  0x68   : > { %v233_v10 = vsub.f32 %v228_v7, %v232_v9 }
  0x6a   : > { %v234_v11 = vmul.f32 %v233_v10, %v225_v1 }
  0x6c   : > { %v235_v12 = vadd.f32 %v234_v11, %v232_v9 }
  0x6e   : > { %v236_v13 = vsub.f32 0.0, %v235_v12 }
  0x70   : > { %240 = vst [vmem:[%s213_s19] sm:$0xff] %v236_v13 }
  0x71   : > { %548 = shalt.err (!%p545_p2)
}
  0x72   : > { %s549_s8 = scalar_lea.hbm %s815_s28, 512  ;;  %s553_s6 = scalar_lea.hbm %s868_s2, 1024 }
  0x73   : > { %p550_p9 = scmp.ne.s32.totalorder %s815_s28, %s549_s8  ;;  %p554_p6 = scmp.lt.u32.totalorder %s815_s28, %s868_s2 }
  0x74   : > { %p555_p13 = scmp.lt.u32.totalorder %s553_s6, %s549_s8  ;;  %p557_p8 = scmp.lt.u32.totalorder %s549_s8, %s815_s28 }
  0x75   : > { %p551_p11 = pnand %p550_p9, %p881_p0 }
  0x76   : > { %p556_p5 = por %p555_p13, %p554_p6 }
  0x77   : > { %p552_p3 = pneg %p551_p11 }
  0x78   : > { %p558_p7 = por %p557_p8, %p556_p5 }
  0x7a   : > { %p559_p4 = pnand %p558_p7, %p552_p3 }
  0x7c   : > { %562 = shalt.err (!%p559_p4)
}
  0x7d   : > { %s626_s7 = smov 128   ;;  %s627_s19 = smov 8  }
  0x7e   : > { %405 = dma.vmem_to_hbm [thread:$0]  (%p881_p0), %s817_s30, 512, %s815_s28, %s258_s29, %s626_s7, %s626_s7, %s627_s19  }
  0x7f PF: > { %s286_s21 = sand.u32 1, %s601_s9   ;;  %p882_p10 = scmp.ne.s32.totalorder %s874_s24, 0 }
  0x80   : > { %p883_p12 = scmp.ge.s32.totalorder %s621_s14, 2  ;;  %s287_s20 = scalar_lea.sflag [#allocation4], %s286_s21 }
  0x82   : > { %p415_p1 = pnand %p883_p12, %p882_p10 }
  0x84   : > { %596 = dma.done.wait (!%p415_p1), %s287_s20, 512  }
  0x85   : > { %598 = vsyncadd (!%p415_p1), %s287_s20, 4294966784  ;;  %s21_s14 = sadd.s32 1, %s621_s14   ;;  %s884_s9 = smov %s605_s10 }
  0x86   : > { %p18_p2 = scmp.ge.s32.totalorder %s21_s14, 4   ;;  %s885_s10 = smov %s609_s11 }
  0x87   : > { %s886_s11 = smov %s699_s23  ;;  %s887_s12 = smov %s617_s13 }
  0x88   : > { %s888_s13 = smov %s890_s17  ;;  %20 = sbr.rel (!%p18_p2) target bundleno = 8 (0x8), region = 93 }
  0x8f   :  { %292 = vsyncpa [#allocation3], 1 }
  0x90   :  { %294 = vsyncpa [#allocation3 + $0x1], 1 }
  0x91   :  { %295 = vsyncpa [#allocation6], 1 }
  0x92   :  { %297 = vsyncpa [#allocation6 + $0x1], 1 }
  0x93   :  { %298 = vsyncpa [#allocation4], 1 }
  0x94   :  { %300 = vsyncpa [#allocation4 + $0x1], 1 }

</bundles_post_ra>
